<compile_context>
chip_gen: v7x
topology: tpu7x:2x2x1
jax: 0.10.0
libtpu: 0.0.40
codegen_flags: <defaults>
</compile_context>

<pallas_src>
import functools

import jax
import jax.numpy as jnp
from jax.experimental import pallas as pl
from jax.experimental.pallas import tpu as pltpu


def _round_up(x: int, m: int) -> int:
    return ((x + m - 1) // m) * m


def qnetwork_kernel(state_ref, w1_ref, b1_ref, w2_ref, b2_ref, w3_ref, b3_ref, out_ref):
    """One batch tile of the forward pass: 3 matmuls + 2 ReLUs, all in VMEM."""
    # Cast MXU inputs to the weight dtype (bf16 fast path when weights are bf16);
    # accumulation stays f32, bias-add / ReLU stay f32 on the VPU.
    x = state_ref[...].astype(w1_ref.dtype)

    h1 = jnp.dot(x, w1_ref[...], preferred_element_type=jnp.float32) + b1_ref[...]
    h1 = jnp.maximum(h1, 0.0)

    h2 = jnp.dot(h1.astype(w2_ref.dtype), w2_ref[...],
                 preferred_element_type=jnp.float32) + b2_ref[...]
    h2 = jnp.maximum(h2, 0.0)

    q = jnp.dot(h2.astype(w3_ref.dtype), w3_ref[...],
                preferred_element_type=jnp.float32) + b3_ref[...]
    out_ref[...] = q.astype(out_ref.dtype)


@functools.partial(jax.jit, static_argnames=("batch_tile",))
def qnetwork_forward(state, params, *, batch_tile: int = 4096):
    """Batched forward pass. state: (batch, state_size) f32; params from init below."""
    w1, b1, w2, b2, w3, b3 = params
    batch, state_size = state.shape
    fc1_units = w1.shape[1]
    fc2_units = w2.shape[1]
    action_size = w3.shape[1]

    # --- Batch tile: multiple of 8 sublanes; for moderate batches split into >= 2
    #     grid steps so v7x's second TensorCore gets work; cap at batch_tile.
    tb_cap = max(8, _round_up(min(batch_tile, batch), 8))
    if 8 < batch <= 2 * batch_tile:
        tb = _round_up(pl.cdiv(batch, 2), 8)
    else:
        tb = tb_cap
    tb = min(tb, tb_cap)
    grid = (pl.cdiv(batch, tb),)  # ragged last block: OOB reads masked on write

    # --- VMEM budget scaled with the tile (128-lane layout padding accounted for),
    #     capped at 48 MiB so v7x (64 MiB physical VMEM) never regresses.
    lane = 128
    row_bytes = 4 * (
        2 * _round_up(state_size, lane)        # double-buffered input tile
        + 2 * _round_up(action_size, lane)     # double-buffered output tile
        + _round_up(fc1_units, lane)           # h1
        + _round_up(fc2_units, lane)           # h2
        + _round_up(action_size, lane)         # q
    )
    w_bytes = sum(int(p.size) * p.dtype.itemsize for p in params)
    vmem_limit = int(min(48 * 1024 * 1024,
                         max(16 * 1024 * 1024, 1.5 * (tb * row_bytes + w_bytes))))

    # Streamed (pipelined/double-buffered) tiles: state in, Q-values out.
    state_spec = pl.BlockSpec((tb, state_size), lambda i: (i, 0))
    out_spec = pl.BlockSpec((tb, action_size), lambda i: (i, 0))

    # Weights/biases: constant block index -> loaded once, VMEM-resident across steps.
    def resident(a):
        return pl.BlockSpec(a.shape, lambda i: tuple(0 for _ in a.shape))

    return pl.pallas_call(
        qnetwork_kernel,
        out_shape=jax.ShapeDtypeStruct((batch, action_size), jnp.float32),
        grid=grid,
        in_specs=[
            state_spec,
            resident(w1), resident(b1),
            resident(w2), resident(b2),
            resident(w3), resident(b3),
        ],
        out_specs=out_spec,
        compiler_params=pltpu.CompilerParams(
            # Batch axis is embarrassingly parallel -> shard across v7x's 2 TCs.
            dimension_semantics=("parallel",),
            vmem_limit_bytes=vmem_limit,
        ),
    )(state, w1, b1, w2, b2, w3, b3)


def init_qnetwork_params(key, state_size, action_size, fc1_units, fc2_units,
                         weight_dtype=jnp.float32):
    """PyTorch nn.Linear-style init: U(-1/sqrt(fan_in), 1/sqrt(fan_in)) for W and b.

    Weights are stored (in_features, out_features) so forward is x @ W + b; biases are
    (1, out_features) rows for TPU-friendly broadcasting.  Pass weight_dtype=bfloat16
    for the MXU fast path in production (matmuls still accumulate in f32).
    """
    def linear(k, fan_in, fan_out):
        kw, kb = jax.random.split(k)
        bound = 1.0 / jnp.sqrt(jnp.float32(fan_in))
        w = jax.random.uniform(kw, (fan_in, fan_out), jnp.float32, -bound, bound)
        b = jax.random.uniform(kb, (1, fan_out), jnp.float32, -bound, bound)
        return w.astype(weight_dtype), b.astype(jnp.float32)

    k1, k2, k3 = jax.random.split(key, 3)
    w1, b1 = linear(k1, state_size, fc1_units)
    w2, b2 = linear(k2, fc1_units, fc2_units)
    w3, b3 = linear(k3, fc2_units, action_size)
    return (w1, b1, w2, b2, w3, b3)


def qnetwork_reference(state, params):
    """Pure-JAX reference for correctness checking."""
    w1, b1, w2, b2, w3, b3 = params
    h1 = jnp.maximum(
        jnp.dot(state, w1, preferred_element_type=jnp.float32) + b1, 0.0)
    h2 = jnp.maximum(
        jnp.dot(h1, w2, preferred_element_type=jnp.float32) + b2, 0.0)
    return jnp.dot(h2, w3, preferred_element_type=jnp.float32) + b3


if __name__ == "__main__":
    # Small shapes consistent with the module: state -> fc1 -> fc2 -> actions.
    batch = 2
    state_size = 8
    fc1_units = 32
    fc2_units = 32
    action_size = 4

    key = jax.random.PRNGKey(0)
    k_params, k_state = jax.random.split(key)

    # f32 weights here so the 1e-5 reference tolerance holds; use bfloat16 in production.
    params = init_qnetwork_params(k_params, state_size, action_size, fc1_units, fc2_units)
    state = jax.random.normal(k_state, (batch, state_size), dtype=jnp.float32)

    q_vals = qnetwork_forward(state, params)
    q_vals = jax.block_until_ready(q_vals)

    q_ref = qnetwork_reference(state, params)
    assert q_vals.shape == (batch, action_size)
    assert jnp.allclose(q_vals, q_ref, atol=1e-5, rtol=1e-5)

    # Exercise the multi-step + ragged-last-block path: 1111 rows, tile 512 -> 3 grid
    # steps with an 87-row masked tail (no wrapper-side padding / slicing anymore).
    big_batch = 1111
    big_state = jax.random.normal(jax.random.PRNGKey(1), (big_batch, state_size),
                                  dtype=jnp.float32)
    q_big = jax.block_until_ready(qnetwork_forward(big_state, params, batch_tile=512))
    q_big_ref = qnetwork_reference(big_state, params)
    assert q_big.shape == (big_batch, action_size)
    assert jnp.allclose(q_big, q_big_ref, atol=1e-4, rtol=1e-5)

    # Moderate batch: tile is halved so the grid has >= 2 "parallel" steps (v7x TCs).
    mid_batch = 1000
    mid_state = jax.random.normal(jax.random.PRNGKey(2), (mid_batch, state_size),
                                  dtype=jnp.float32)
    q_mid = jax.block_until_ready(qnetwork_forward(mid_state, params))
    q_mid_ref = qnetwork_reference(mid_state, params)
    assert q_mid.shape == (mid_batch, action_size)
    assert jnp.allclose(q_mid, q_mid_ref, atol=1e-4, rtol=1e-5)

    print("KERNEL_OK")
</pallas_src>

<mosaic_0001>
module attributes {stable_mosaic.version = 11 : i64} {
  func.func @qnetwork_kernel(%arg0: i32, %arg1: memref<8x8xf32, #tpu.memory_space<vmem>>, %arg2: memref<8x32xf32, #tpu.memory_space<vmem>>, %arg3: memref<1x32xf32, #tpu.memory_space<vmem>>, %arg4: memref<32x32xf32, #tpu.memory_space<vmem>>, %arg5: memref<1x32xf32, #tpu.memory_space<vmem>>, %arg6: memref<32x4xf32, #tpu.memory_space<vmem>>, %arg7: memref<1x4xf32, #tpu.memory_space<vmem>>, %arg8: memref<8x4xf32, #tpu.memory_space<vmem>>) attributes {dimension_semantics = [#tpu.dimension_semantics<parallel>], iteration_bounds = array<i64: 1>, scalar_prefetch = 0 : i64, scratch_operands = 0 : i64, tpu.core_type = #tpu.core_type<tc>, window_params = [{transform_indices = @transform_0, window_bounds = array<i64: 8, 8>}, {pipeline_mode = #tpu.pipeline_mode<synchronous>, transform_indices = @transform_1, window_bounds = array<i64: 8, 32>}, {pipeline_mode = #tpu.pipeline_mode<synchronous>, transform_indices = @transform_2, window_bounds = array<i64: 1, 32>}, {pipeline_mode = #tpu.pipeline_mode<synchronous>, transform_indices = @transform_3, window_bounds = array<i64: 32, 32>}, {pipeline_mode = #tpu.pipeline_mode<synchronous>, transform_indices = @transform_4, window_bounds = array<i64: 1, 32>}, {pipeline_mode = #tpu.pipeline_mode<synchronous>, transform_indices = @transform_5, window_bounds = array<i64: 32, 4>}, {pipeline_mode = #tpu.pipeline_mode<synchronous>, transform_indices = @transform_6, window_bounds = array<i64: 1, 4>}, {transform_indices = @transform_7, window_bounds = array<i64: 8, 4>}]} {
    %c0 = arith.constant 0 : index
    %c0_0 = arith.constant 0 : index
    %0 = vector.load %arg1[%c0, %c0_0] : memref<8x8xf32, #tpu.memory_space<vmem>>, vector<8x8xf32>
    %c0_1 = arith.constant 0 : index
    %c0_2 = arith.constant 0 : index
    %1 = vector.load %arg2[%c0_1, %c0_2] : memref<8x32xf32, #tpu.memory_space<vmem>>, vector<8x32xf32>
    %cst = arith.constant dense<0.000000e+00> : vector<8x32xf32>
    %2 = tpu.matmul %0, %1, %cst {dimension_numbers = #tpu.dot_dimension_numbers<[1], [0], [0], [1], [0, 0, 1, 1], [], []>} : vector<8x8xf32>, vector<8x32xf32>, vector<8x32xf32> -> vector<8x32xf32>
    %c0_3 = arith.constant 0 : index
    %c0_4 = arith.constant 0 : index
    %3 = vector.load %arg3[%c0_3, %c0_4] : memref<1x32xf32, #tpu.memory_space<vmem>>, vector<1x32xf32>
    %4 = vector.broadcast %3 : vector<1x32xf32> to vector<8x32xf32>
    %5 = arith.addf %2, %4 : vector<8x32xf32>
    %cst_5 = arith.constant 0.000000e+00 : f32
    %6 = vector.broadcast %cst_5 : f32 to vector<8x32xf32>
    %7 = arith.maximumf %5, %6 : vector<8x32xf32>
    %c0_6 = arith.constant 0 : index
    %c0_7 = arith.constant 0 : index
    %8 = vector.load %arg4[%c0_6, %c0_7] : memref<32x32xf32, #tpu.memory_space<vmem>>, vector<32x32xf32>
    %cst_8 = arith.constant dense<0.000000e+00> : vector<8x32xf32>
    %9 = tpu.matmul %7, %8, %cst_8 {dimension_numbers = #tpu.dot_dimension_numbers<[1], [0], [0], [1], [0, 0, 1, 1], [], []>} : vector<8x32xf32>, vector<32x32xf32>, vector<8x32xf32> -> vector<8x32xf32>
    %c0_9 = arith.constant 0 : index
    %c0_10 = arith.constant 0 : index
    %10 = vector.load %arg5[%c0_9, %c0_10] : memref<1x32xf32, #tpu.memory_space<vmem>>, vector<1x32xf32>
    %11 = vector.broadcast %10 : vector<1x32xf32> to vector<8x32xf32>
    %12 = arith.addf %9, %11 : vector<8x32xf32>
    %cst_11 = arith.constant 0.000000e+00 : f32
    %13 = vector.broadcast %cst_11 : f32 to vector<8x32xf32>
    %14 = arith.maximumf %12, %13 : vector<8x32xf32>
    %c0_12 = arith.constant 0 : index
    %c0_13 = arith.constant 0 : index
    %15 = vector.load %arg6[%c0_12, %c0_13] : memref<32x4xf32, #tpu.memory_space<vmem>>, vector<32x4xf32>
    %cst_14 = arith.constant dense<0.000000e+00> : vector<8x4xf32>
    %16 = tpu.matmul %14, %15, %cst_14 {dimension_numbers = #tpu.dot_dimension_numbers<[1], [0], [0], [1], [0, 0, 1, 1], [], []>} : vector<8x32xf32>, vector<32x4xf32>, vector<8x4xf32> -> vector<8x4xf32>
    %c0_15 = arith.constant 0 : index
    %c0_16 = arith.constant 0 : index
    %17 = vector.load %arg7[%c0_15, %c0_16] : memref<1x4xf32, #tpu.memory_space<vmem>>, vector<1x4xf32>
    %18 = vector.broadcast %17 : vector<1x4xf32> to vector<8x4xf32>
    %19 = arith.addf %16, %18 : vector<8x4xf32>
    %c0_17 = arith.constant 0 : index
    %c0_18 = arith.constant 0 : index
    %20 = vector.load %arg8[%c0_17, %c0_18] : memref<8x4xf32, #tpu.memory_space<vmem>>, vector<8x4xf32>
    tpu.vector_store %arg8[%c0_17, %c0_18], %19 {strides = array<i32>} : memref<8x4xf32, #tpu.memory_space<vmem>>, vector<8x4xf32>,
    return
  }
  func.func @transform_0(%arg0: i32) -> (i32, i32) {
    %c0_i32 = arith.constant 0 : i32
    %c0_i32_0 = arith.constant 0 : i32
    return %arg0, %c0_i32 : i32, i32
  }
  func.func @transform_1(%arg0: i32) -> (i32, i32) {
    %c0_i32 = arith.constant 0 : i32
    %c0_i32_0 = arith.constant 0 : i32
    %c0_i32_1 = arith.constant 0 : i32
    return %c0_i32, %c0_i32_0 : i32, i32
  }
  func.func @transform_2(%arg0: i32) -> (i32, i32) {
    %c0_i32 = arith.constant 0 : i32
    %c0_i32_0 = arith.constant 0 : i32
    %c0_i32_1 = arith.constant 0 : i32
    return %c0_i32, %c0_i32_0 : i32, i32
  }
  func.func @transform_3(%arg0: i32) -> (i32, i32) {
    %c0_i32 = arith.constant 0 : i32
    %c0_i32_0 = arith.constant 0 : i32
    %c0_i32_1 = arith.constant 0 : i32
    return %c0_i32, %c0_i32_0 : i32, i32
  }
  func.func @transform_4(%arg0: i32) -> (i32, i32) {
    %c0_i32 = arith.constant 0 : i32
    %c0_i32_0 = arith.constant 0 : i32
    %c0_i32_1 = arith.constant 0 : i32
    return %c0_i32, %c0_i32_0 : i32, i32
  }
  func.func @transform_5(%arg0: i32) -> (i32, i32) {
    %c0_i32 = arith.constant 0 : i32
    %c0_i32_0 = arith.constant 0 : i32
    %c0_i32_1 = arith.constant 0 : i32
    return %c0_i32, %c0_i32_0 : i32, i32
  }
  func.func @transform_6(%arg0: i32) -> (i32, i32) {
    %c0_i32 = arith.constant 0 : i32
    %c0_i32_0 = arith.constant 0 : i32
    %c0_i32_1 = arith.constant 0 : i32
    return %c0_i32, %c0_i32_0 : i32, i32
  }
  func.func @transform_7(%arg0: i32) -> (i32, i32) {
    %c0_i32 = arith.constant 0 : i32
    %c0_i32_0 = arith.constant 0 : i32
    return %arg0, %c0_i32 : i32, i32
  }
}

</mosaic_0001>

<bundles_post_ra>
// kernel: qnetwork_forward.1
= control target key start
LH: loop header
LB: loop body
LE: loop exit
PB: predicated region body
PF: predicated region fallthrough
CT: control target
= control target key end

     0   :  { %12 = vsyncpa [#allocation3], 0  ;;  %v386_v2 = vmov 0.0   ;;  %vm387_vm0 = vmmov 0   ;;  %vm36_vm1 = vcmask 64512   ;;  %v388_v5 = vmov 0.0|0.0   ;;  %s483_s0 = inlined_call_operand.vmem [shape: f32[2,8], index: 0, kind: input, shape index: {}]   ;;  %s484_s1 = inlined_call_operand.vmem [shape: f32[8,32], index: 1, kind: input, shape index: {}]   ;;  %s485_s2 = inlined_call_operand.vmem [shape: f32[1,32], index: 2, kind: input, shape index: {}]   ;;  %s486_s3 = inlined_call_operand.vmem [shape: f32[32,32], index: 3, kind: input, shape index: {}]   ;;  %s487_s4 = inlined_call_operand.vmem [shape: f32[1,32], index: 4, kind: input, shape index: {}]   ;;  %s488_s5 = inlined_call_operand.vmem [shape: f32[32,4], index: 5, kind: input, shape index: {}]   ;;  %s489_s6 = inlined_call_operand.vmem [shape: f32[1,4], index: 6, kind: input, shape index: {}]   ;;  %s490_s7 = inlined_call_operand.hbm [shape: f32[2,4], index: 7, kind: output, shape index: {}]  }
   0x1   :  { %v28_v0 = vld [vmem:[%s484_s1] sm:$0xff]  ;;  %317 = vmatprep.subr.mxu0 %v386_v2  ;;  %319 = vmatprep.mubr.msk.f32.mxu0 %vm387_vm0, %v386_v2  ;;  %v112_v4 = vld [vmem:[%s486_s3 + $0x8] sm:$0xff]  ;;  %v113_v7 = vld [vmem:[%s486_s3 + $0x10] sm:$0xff]  ;;  %vm122_vm2 = vcmask 261120   ;;  %vm281_vm3 = vcmask 31744  }
   0x2   :  { %v27_v1 = vld [vmem:[%s483_s0] sm:$0xff]  ;;  %318 = vmatpush3.msra.mxu0 %v28_v0  ;;  %344 = vmatprep.subr.bf16.mxu1 %v388_v5  ;;  %v114_v8 = vld [vmem:[%s486_s3 + $0x18] sm:$0xff]  ;;  %v198_v11 = vld [vmem:[%s488_s5 + $0x8] sm:$0xff] }
   0x3   :  { %v111_v3 = vld [vmem:[%s486_s3] sm:$0xff]  ;;  %320 = vmatmul.mubr.msk.f32.vlgmr.msra.gmra.mrb[0].mxu0 %vm36_vm1, %v27_v1  ;;  %330 = vmatprep.mubr.msk.f32.mxu1 %vm387_vm0, %v386_v2  ;;  %v348_v9 = vpack.c.bf16 %v114_v8, %v113_v7  ;;  %v199_v18 = vld [vmem:[%s488_s5 + $0x10] sm:$0xff]  ;;  %v200_v19 = vld [vmem:[%s488_s5 + $0x18] sm:$0xff] }
   0x4   :  { %v345_v6 = vpack.c.bf16 %v112_v4, %v111_v3  ;;  %350 = vmatprep.subr.bf16.mxu0 %v388_v5  ;;  %341 = vmatprep.mubr.msk.f32.mxu0 %vm387_vm0, %v386_v2  ;;  %v197_v10 = vld [vmem:[%s488_s5] sm:$0xff]  ;;  %v354_v20 = vpack.c.bf16 %v200_v19, %v199_v18 }
   0x5   :  { %v351_v12 = vpack.c.bf16 %v198_v11, %v197_v10  ;;  %v299_v13 = vld [vmem:[%s485_s2] ss:$0 sm:$0xff] }
   0x6   :  { %346 = vmatpush3.bf16.msra.mxu1 %v345_v6  ;;  %v301_v21 = vld [vmem:[%s487_s4] ss:$0 sm:$0xff] }
   0x7   :  { %347 = vmatprep.subr.bf16.mxu1 %v388_v5  ;;  %352 = vmatpush3.bf16.msra.mxu0 %v351_v12  ;;  %v303_v26 = vld [vmem:[%s489_s6] ss:$0 sm:$0xff] }
   0x8   :  { %353 = vmatprep.subr.bf16.mxu0 %v388_v5 }
   0xa   :  { %349 = vmatpush3.bf16.msra.mxu1 %v348_v9 }
   0xb   :  { %355 = vmatpush3.bf16.msra.mxu0 %v354_v20 }
  0xd6   :  { %v106_v14 = vpop.f32.mrb[0].mxu0 }
  0xd7   :  { %v107_v15 = vadd.f32 %v299_v13, %v106_v14  ;;  %v321_v16 = vpop.f32.mrb[1].mxu0 }
  0xd9   :  { %v110_v17 = vmax.f32 %v107_v15, 0.0 }
  0xdb   :  { %331 = vmatmul.mubr.msk.f32.vlgmr.msra.gmra.mrb[0].mxu1 %vm122_vm2, %v110_v17 }
 0x1ae   :  { %v192_v22 = vpop.f32.mrb[0].mxu1 }
 0x1af   :  { %v193_v23 = vadd.f32 %v301_v21, %v192_v22  ;;  %v332_v24 = vpop.f32.mrb[1].mxu1 }
 0x1b1   :  { %v196_v25 = vmax.f32 %v193_v23, 0.0 }
 0x1b3   :  { %342 = vmatmul.mubr.msk.f32.vlgmr.msra.gmra.mrb[2].mxu0 %vm122_vm2, %v196_v25 }
 0x286   :  { %v277_v27 = vpop.f32.mrb[2].mxu0 }
 0x287   :  { %v278_v28 = vadd.f32 %v303_v26, %v277_v27  ;;  %v343_v29 = vpop.f32.mrb[3].mxu0 }
 0x289   :  { %282 = vst.msk [vmem:[#allocation2] sm:$0xff] %vm281_vm3, %v278_v28 }
 0x28a   :  { %287 = vsyncadd [#allocation3], 96  ;;  %s389_s5 = smov [#allocation2]  }
 0x28b   :  { %s288_s23 = sshll.u32 %s389_s5, 4  ;;  %s289_s23 = int_to_ptr.vmem [resolvable:$true] %s288_s23 }
 0x28c   :  { %s362_s24 = scalar_lea.vmem %s289_s23, 32  ;;  %s366_s4 = scalar_lea.vmem %s289_s23, 128 }
 0x28d   :  { %p363_p0 = scmp.ne.s32.totalorder %s289_s23, %s362_s24  ;;  %p367_p1 = scmp.lt.s32.totalorder %s289_s23, %s289_s23 }
 0x28e   :  { %p368_p2 = scmp.lt.s32.totalorder %s366_s4, %s362_s24 }
 0x290   :  { %p369_p3 = por %p368_p2, %p367_p1 }
 0x292   :  { %p370_p4 = pnand %p369_p3, %p363_p0 }
 0x294   :  { %373 = shalt.err (!%p370_p4)
}
 0x295   :  { %s374_s6 = scalar_lea.hbm %s490_s7, 32 }
 0x296   :  { %p375_p5 = scmp.ne.s32.totalorder %s490_s7, %s374_s6  ;;  %p378_p6 = scmp.lt.u32.totalorder %s374_s6, %s490_s7 }
 0x298   :  { %p380_p7 = pnand %p378_p6, %p375_p5 }
 0x29a   :  { %383 = shalt.err (!%p380_p7)
}
 0x29b   :  { %s390_s8 = smov 32   ;;  %s391_s0 = smov 2  }
 0x29c   :  { %294 = dma.vmem_to_hbm [thread:$0]  %s289_s23, 32, %s490_s7, [#allocation3], %s390_s8, %s390_s8, %s391_s0  }
 0x29d   :  { %384 = dma.done.wait [#allocation3], 128  }
 0x29e   :  { %385 = vsyncadd [#allocation3], 4294967168 }
 0x29f   :  { %298 = vsyncpa [#allocation3], 1 }

</bundles_post_ra>
